<compile_context>
chip_gen: v6e
topology: v6e:2x2x1
jax: 0.10.0
libtpu: 0.0.40
codegen_flags: <defaults>
</compile_context>

<pallas_src>
import functools

import jax
import jax.numpy as jnp
import numpy as np
from jax.experimental import pallas as pl
from jax.experimental.pallas import tpu as pltpu

# Conservative double-buffered VMEM budget: v7x has 64 MiB physical VMEM
# (32 MiB scoped default); v5e/v6e have 128 MiB, so this is safe everywhere.
_VMEM_BUDGET = 40 * 1024 * 1024
_VMEM_LIMIT_CAP = 48 * 1024 * 1024


def make_relative_position_index(h, w):
    """Static (h*w, h*w) int32 index — mirrors the module's __init__ exactly."""
    coords_h = np.arange(h)
    coords_w = np.arange(w)
    coords = np.stack(np.meshgrid(coords_h, coords_w, indexing="ij"))       # (2, h, w)
    coords_flatten = coords.reshape(2, -1)                                   # (2, h*w)
    relative_coords = coords_flatten[:, :, None] - coords_flatten[:, None, :]
    relative_coords = relative_coords.transpose(1, 2, 0).copy()              # (h*w, h*w, 2)
    relative_coords[:, :, 0] += h - 1
    relative_coords[:, :, 1] += w - 1
    relative_coords[:, :, 0] *= 2 * h - 1            # (matches the module verbatim)
    return jnp.asarray(relative_coords.sum(-1), dtype=jnp.int32)


def precompute_bias_src(table, rel_index, *, h, w):
    """Tiny head-major table gather: (nh, h, w, h*w).

    rel_index is a static buffer, so in a real module this result should be
    cached across forward() calls (recomputed only when `table` changes),
    removing the extra XLA launch + HBM round trip flagged in review.
    """
    num_heads = table.shape[1]
    hw = h * w
    gathered = jnp.take(table.T, rel_index.reshape(-1), axis=1)   # (nh, hw*hw)
    return gathered.reshape(num_heads, h, w, hw)


def _select_tiling(num_heads, h, w, rh, rw, hw, itemsize):
    """Pick (heads_per_block, source_rows_per_block)."""
    sub = max(8, 32 // itemsize)          # native sublane tile: f32=8, bf16=16, i8/fp8=32
    out_cols = rw * hw

    def vmem_need(hpb, gh):
        in_blk = hpb * gh * w * hw * itemsize
        out_blk = hpb * gh * rh * w * out_cols * itemsize
        return 2 * (in_blk + out_blk)

    # Preferred: whole heads per step, as many heads as fit the budget while
    # keeping >= 2 grid steps (v7x megacore) when num_heads allows it.
    if vmem_need(1, h) <= _VMEM_BUDGET:
        min_steps = 2 if num_heads >= 2 else 1
        hpb = 1
        for cand in range(num_heads, 0, -1):
            if num_heads % cand:
                continue
            if num_heads // cand < min_steps:
                continue
            if vmem_need(cand, h) <= _VMEM_BUDGET:
                hpb = cand
                break
        return hpb, h

    # A single whole head does not fit: one head per step, tile source rows.
    # Pick the LARGEST divisor of h whose output block stays sublane-aligned
    # (or is the full row extent) and fits the budget.
    for cand in range(h, 0, -1):
        if h % cand:
            continue
        if cand != h and (cand * rh * w) % sub != 0:
            continue
        if vmem_need(1, cand) <= _VMEM_BUDGET:
            return 1, cand
    # Degenerate fallback (nothing aligned fits): smallest aligned divisor,
    # vmem_limit_bytes is raised accordingly by the caller.
    for cand in range(1, h + 1):
        if h % cand == 0 and ((cand * rh * w) % sub == 0 or cand == h):
            return 1, cand
    return 1, h


def _expand_kernel(src_ref, o_ref, *, rh, rw, gh, hpb, w, hw):
    # src_ref: (hpb, gh, w, hw)          gathered bias rows, hw on lanes
    # o_ref:   (hpb, gh*rh*w, rw*hw)     expanded block in final row-major order
    for n in range(hpb):                              # static unroll (small)
        for g in range(gh):
            src = src_ref[n, g]                       # (w, hw)
            if rw > 1:
                # Lane-dense replication in one op (row[j, rj*hw + k] = src[j, k]);
                # equivalent to broadcast_to(src[:,None,:], (w,rw,hw)).reshape(w,-1).
                row = jnp.tile(src, (1, rw))           # (w, rw*hw)
            else:
                row = src
            row = row.astype(o_ref.dtype)
            base = g * rh * w
            for r in range(rh):
                # rh unrolled, full-lane-width stores at static offsets: no big
                # sublane concat / block intermediate, no masked partial stores.
                o_ref[n, pl.ds(base + r * w, w), :] = row


def relative_position_bias_pallas(table, rel_index, *, h, w, H, W, bias_src=None):
    """Pallas TPU equivalent of RelativePositionBias.forward(H, W).

    table:     ((2h-1)*(2w-1), num_heads) parameter
    rel_index: (h*w, h*w) int32 static buffer
    bias_src:  optional cached precompute_bias_src(table, rel_index, ...)
    returns:   (1, num_heads, H*W, h*w)
    """
    assert H % h == 0 and W % w == 0, "forward assumes H, W divisible by h, w"
    num_heads = table.shape[1]
    hw = h * w
    rh, rw = H // h, W // w
    dtype = table.dtype
    itemsize = jnp.dtype(dtype).itemsize

    if bias_src is None:
        bias_src = precompute_bias_src(table, rel_index, h=h, w=w)

    hpb, gh = _select_tiling(num_heads, h, w, rh, rw, hw, itemsize)
    blk_rows = gh * rh * w
    out_rows = H * w
    out_cols = rw * hw                       # lane-dense output rows
    grid = (num_heads // hpb, h // gh)
    total_steps = grid[0] * grid[1]

    in_blk_bytes = hpb * gh * w * hw * itemsize
    out_blk_bytes = hpb * blk_rows * out_cols * itemsize

    # Deeper output buffering only pays off when the grid stays long.
    out_bufs = 2
    out_spec_kwargs = {}
    if total_steps >= 8 and 2 * in_blk_bytes + 3 * out_blk_bytes <= _VMEM_BUDGET:
        out_bufs = 3
        out_spec_kwargs = dict(pipeline_mode=pl.Buffered(3))

    vmem_need = 2 * in_blk_bytes + out_bufs * out_blk_bytes
    vmem_limit = int(min(_VMEM_LIMIT_CAP, max(2 * vmem_need, 8 * 1024 * 1024)))

    bytes_out = num_heads * out_rows * out_cols * itemsize
    bytes_in = num_heads * h * w * hw * itemsize

    kernel = functools.partial(
        _expand_kernel, rh=rh, rw=rw, gh=gh, hpb=hpb, w=w, hw=hw)

    out_k = pl.pallas_call(
        kernel,
        out_shape=jax.ShapeDtypeStruct((num_heads, out_rows, out_cols), dtype),
        grid_spec=pltpu.PrefetchScalarGridSpec(
            num_scalar_prefetch=0,
            grid=grid,
            in_specs=[
                pl.BlockSpec((hpb, gh, w, hw), lambda n, t: (n, t, 0, 0)),
            ],
            out_specs=pl.BlockSpec(
                (hpb, blk_rows, out_cols), lambda n, t: (n, t, 0),
                **out_spec_kwargs),
        ),
        compiler_params=pltpu.CompilerParams(
            dimension_semantics=("parallel", "parallel"),
            vmem_limit_bytes=vmem_limit),
        cost_estimate=pl.CostEstimate(
            flops=0, transcendentals=0, bytes_accessed=bytes_in + bytes_out),
    )(bias_src)

    # (nh, H*w, rw*hw) is row-major identical to (1, nh, H*W, hw): free reshape.
    return out_k.reshape(1, num_heads, H * W, hw)


def relative_position_bias_reference(table, rel_index, *, h, w, H, W):
    """Plain-JAX reference mirroring the PyTorch forward line-by-line."""
    num_heads = table.shape[1]
    hw = h * w
    bias = table[rel_index.reshape(-1)].reshape(h, w, hw, num_heads)
    bias = jnp.repeat(bias, H // h, axis=0)         # repeat_interleave dim=0 (image rows)
    bias = jnp.repeat(bias, W // w, axis=1)         # repeat_interleave dim=1 (image cols)
    return bias.reshape(H * W, hw, num_heads).transpose(2, 0, 1)[None]


if __name__ == "__main__":
    key = jax.random.PRNGKey(0)

    num_heads, h, w = 4, 8, 8           # module config (small)
    H, W = 16, 16                        # forward(H, W): 2x expansion each way

    table = 0.02 * jax.random.normal(
        key, ((2 * h - 1) * (2 * w - 1), num_heads), dtype=jnp.float32)
    rel_index = make_relative_position_index(h, w)

    # The gather is cached (rel_index is static) so the Pallas call is the only
    # per-forward work.
    bias_src = precompute_bias_src(table, rel_index, h=h, w=w)

    out = relative_position_bias_pallas(
        table, rel_index, h=h, w=w, H=H, W=W, bias_src=bias_src)
    out = jax.block_until_ready(out)

    ref = relative_position_bias_reference(table, rel_index, h=h, w=w, H=H, W=W)
    assert out.shape == (1, num_heads, H * W, h * w)
    assert bool(jnp.array_equal(out, ref)), "mismatch vs reference"

    print("KERNEL_OK")
</pallas_src>

<mosaic_0001>
module attributes {stable_mosaic.version = 11 : i64} {
  func.func @_expand_kernel(%arg0: i32, %arg1: i32, %arg2: memref<2x8x8x64xf32, #tpu.memory_space<vmem>>, %arg3: memref<2x128x128xf32, #tpu.memory_space<vmem>>) attributes {dimension_semantics = [#tpu.dimension_semantics<parallel>, #tpu.dimension_semantics<parallel>], iteration_bounds = array<i64: 2, 1>, scalar_prefetch = 0 : i64, scratch_operands = 0 : i64, tpu.core_type = #tpu.core_type<tc>, window_params = [{transform_indices = @transform_0, window_bounds = array<i64: 2, 8, 8, 64>}, {transform_indices = @transform_1, window_bounds = array<i64: 2, 128, 128>}]} {
    %c0 = arith.constant 0 : index
    %c0_0 = arith.constant 0 : index
    %c0_1 = arith.constant 0 : index
    %c0_2 = arith.constant 0 : index
    %0 = vector.load %arg2[%c0, %c0_0, %c0_1, %c0_2] : memref<2x8x8x64xf32, #tpu.memory_space<vmem>>, vector<1x1x8x64xf32>
    %1 = vector.shape_cast %0 : vector<1x1x8x64xf32> to vector<8x64xf32>
    %2 = tpu.concatenate %1, %1 in 1 : vector<8x64xf32>, vector<8x64xf32> -> vector<8x128xf32>
    %c0_3 = arith.constant 0 : index
    %c0_4 = arith.constant 0 : index
    %c0_5 = arith.constant 0 : index
    %3 = vector.load %arg3[%c0_3, %c0_4, %c0_5] : memref<2x128x128xf32, #tpu.memory_space<vmem>>, vector<1x8x128xf32>
    %4 = vector.shape_cast %3 : vector<1x8x128xf32> to vector<8x128xf32>
    %5 = vector.shape_cast %2 : vector<8x128xf32> to vector<1x8x128xf32>
    tpu.vector_store %arg3[%c0_3, %c0_4, %c0_5], %5 {strides = array<i32>} : memref<2x128x128xf32, #tpu.memory_space<vmem>>, vector<1x8x128xf32>,
    %c0_6 = arith.constant 0 : index
    %c8 = arith.constant 8 : index
    %c0_7 = arith.constant 0 : index
    %6 = vector.load %arg3[%c0_6, %c8, %c0_7] : memref<2x128x128xf32, #tpu.memory_space<vmem>>, vector<1x8x128xf32>
    %7 = vector.shape_cast %6 : vector<1x8x128xf32> to vector<8x128xf32>
    %8 = vector.shape_cast %2 : vector<8x128xf32> to vector<1x8x128xf32>
    tpu.vector_store %arg3[%c0_6, %c8, %c0_7], %8 {strides = array<i32>} : memref<2x128x128xf32, #tpu.memory_space<vmem>>, vector<1x8x128xf32>,
    %c0_8 = arith.constant 0 : index
    %c1 = arith.constant 1 : index
    %c0_9 = arith.constant 0 : index
    %c0_10 = arith.constant 0 : index
    %9 = vector.load %arg2[%c0_8, %c1, %c0_9, %c0_10] : memref<2x8x8x64xf32, #tpu.memory_space<vmem>>, vector<1x1x8x64xf32>
    %10 = vector.shape_cast %9 : vector<1x1x8x64xf32> to vector<8x64xf32>
    %11 = tpu.concatenate %10, %10 in 1 : vector<8x64xf32>, vector<8x64xf32> -> vector<8x128xf32>
    %c0_11 = arith.constant 0 : index
    %c16 = arith.constant 16 : index
    %c0_12 = arith.constant 0 : index
    %12 = vector.load %arg3[%c0_11, %c16, %c0_12] : memref<2x128x128xf32, #tpu.memory_space<vmem>>, vector<1x8x128xf32>
    %13 = vector.shape_cast %12 : vector<1x8x128xf32> to vector<8x128xf32>
    %14 = vector.shape_cast %11 : vector<8x128xf32> to vector<1x8x128xf32>
    tpu.vector_store %arg3[%c0_11, %c16, %c0_12], %14 {strides = array<i32>} : memref<2x128x128xf32, #tpu.memory_space<vmem>>, vector<1x8x128xf32>,
    %c0_13 = arith.constant 0 : index
    %c24 = arith.constant 24 : index
    %c0_14 = arith.constant 0 : index
    %15 = vector.load %arg3[%c0_13, %c24, %c0_14] : memref<2x128x128xf32, #tpu.memory_space<vmem>>, vector<1x8x128xf32>
    %16 = vector.shape_cast %15 : vector<1x8x128xf32> to vector<8x128xf32>
    %17 = vector.shape_cast %11 : vector<8x128xf32> to vector<1x8x128xf32>
    tpu.vector_store %arg3[%c0_13, %c24, %c0_14], %17 {strides = array<i32>} : memref<2x128x128xf32, #tpu.memory_space<vmem>>, vector<1x8x128xf32>,
    %c0_15 = arith.constant 0 : index
    %c2 = arith.constant 2 : index
    %c0_16 = arith.constant 0 : index
    %c0_17 = arith.constant 0 : index
    %18 = vector.load %arg2[%c0_15, %c2, %c0_16, %c0_17] : memref<2x8x8x64xf32, #tpu.memory_space<vmem>>, vector<1x1x8x64xf32>
    %19 = vector.shape_cast %18 : vector<1x1x8x64xf32> to vector<8x64xf32>
    %20 = tpu.concatenate %19, %19 in 1 : vector<8x64xf32>, vector<8x64xf32> -> vector<8x128xf32>
    %c0_18 = arith.constant 0 : index
    %c32 = arith.constant 32 : index
    %c0_19 = arith.constant 0 : index
    %21 = vector.load %arg3[%c0_18, %c32, %c0_19] : memref<2x128x128xf32, #tpu.memory_space<vmem>>, vector<1x8x128xf32>
    %22 = vector.shape_cast %21 : vector<1x8x128xf32> to vector<8x128xf32>
    %23 = vector.shape_cast %20 : vector<8x128xf32> to vector<1x8x128xf32>
    tpu.vector_store %arg3[%c0_18, %c32, %c0_19], %23 {strides = array<i32>} : memref<2x128x128xf32, #tpu.memory_space<vmem>>, vector<1x8x128xf32>,
    %c0_20 = arith.constant 0 : index
    %c40 = arith.constant 40 : index
    %c0_21 = arith.constant 0 : index
    %24 = vector.load %arg3[%c0_20, %c40, %c0_21] : memref<2x128x128xf32, #tpu.memory_space<vmem>>, vector<1x8x128xf32>
    %25 = vector.shape_cast %24 : vector<1x8x128xf32> to vector<8x128xf32>
    %26 = vector.shape_cast %20 : vector<8x128xf32> to vector<1x8x128xf32>
    tpu.vector_store %arg3[%c0_20, %c40, %c0_21], %26 {strides = array<i32>} : memref<2x128x128xf32, #tpu.memory_space<vmem>>, vector<1x8x128xf32>,
    %c0_22 = arith.constant 0 : index
    %c3 = arith.constant 3 : index
    %c0_23 = arith.constant 0 : index
    %c0_24 = arith.constant 0 : index
    %27 = vector.load %arg2[%c0_22, %c3, %c0_23, %c0_24] : memref<2x8x8x64xf32, #tpu.memory_space<vmem>>, vector<1x1x8x64xf32>
    %28 = vector.shape_cast %27 : vector<1x1x8x64xf32> to vector<8x64xf32>
    %29 = tpu.concatenate %28, %28 in 1 : vector<8x64xf32>, vector<8x64xf32> -> vector<8x128xf32>
    %c0_25 = arith.constant 0 : index
    %c48 = arith.constant 48 : index
    %c0_26 = arith.constant 0 : index
    %30 = vector.load %arg3[%c0_25, %c48, %c0_26] : memref<2x128x128xf32, #tpu.memory_space<vmem>>, vector<1x8x128xf32>
    %31 = vector.shape_cast %30 : vector<1x8x128xf32> to vector<8x128xf32>
    %32 = vector.shape_cast %29 : vector<8x128xf32> to vector<1x8x128xf32>
    tpu.vector_store %arg3[%c0_25, %c48, %c0_26], %32 {strides = array<i32>} : memref<2x128x128xf32, #tpu.memory_space<vmem>>, vector<1x8x128xf32>,
    %c0_27 = arith.constant 0 : index
    %c56 = arith.constant 56 : index
    %c0_28 = arith.constant 0 : index
    %33 = vector.load %arg3[%c0_27, %c56, %c0_28] : memref<2x128x128xf32, #tpu.memory_space<vmem>>, vector<1x8x128xf32>
    %34 = vector.shape_cast %33 : vector<1x8x128xf32> to vector<8x128xf32>
    %35 = vector.shape_cast %29 : vector<8x128xf32> to vector<1x8x128xf32>
    tpu.vector_store %arg3[%c0_27, %c56, %c0_28], %35 {strides = array<i32>} : memref<2x128x128xf32, #tpu.memory_space<vmem>>, vector<1x8x128xf32>,
    %c0_29 = arith.constant 0 : index
    %c4 = arith.constant 4 : index
    %c0_30 = arith.constant 0 : index
    %c0_31 = arith.constant 0 : index
    %36 = vector.load %arg2[%c0_29, %c4, %c0_30, %c0_31] : memref<2x8x8x64xf32, #tpu.memory_space<vmem>>, vector<1x1x8x64xf32>
    %37 = vector.shape_cast %36 : vector<1x1x8x64xf32> to vector<8x64xf32>
    %38 = tpu.concatenate %37, %37 in 1 : vector<8x64xf32>, vector<8x64xf32> -> vector<8x128xf32>
    %c0_32 = arith.constant 0 : index
    %c64 = arith.constant 64 : index
    %c0_33 = arith.constant 0 : index
    %39 = vector.load %arg3[%c0_32, %c64, %c0_33] : memref<2x128x128xf32, #tpu.memory_space<vmem>>, vector<1x8x128xf32>
    %40 = vector.shape_cast %39 : vector<1x8x128xf32> to vector<8x128xf32>
    %41 = vector.shape_cast %38 : vector<8x128xf32> to vector<1x8x128xf32>
    tpu.vector_store %arg3[%c0_32, %c64, %c0_33], %41 {strides = array<i32>} : memref<2x128x128xf32, #tpu.memory_space<vmem>>, vector<1x8x128xf32>,
    %c0_34 = arith.constant 0 : index
    %c72 = arith.constant 72 : index
    %c0_35 = arith.constant 0 : index
    %42 = vector.load %arg3[%c0_34, %c72, %c0_35] : memref<2x128x128xf32, #tpu.memory_space<vmem>>, vector<1x8x128xf32>
    %43 = vector.shape_cast %42 : vector<1x8x128xf32> to vector<8x128xf32>
    %44 = vector.shape_cast %38 : vector<8x128xf32> to vector<1x8x128xf32>
    tpu.vector_store %arg3[%c0_34, %c72, %c0_35], %44 {strides = array<i32>} : memref<2x128x128xf32, #tpu.memory_space<vmem>>, vector<1x8x128xf32>,
    %c0_36 = arith.constant 0 : index
    %c5 = arith.constant 5 : index
    %c0_37 = arith.constant 0 : index
    %c0_38 = arith.constant 0 : index
    %45 = vector.load %arg2[%c0_36, %c5, %c0_37, %c0_38] : memref<2x8x8x64xf32, #tpu.memory_space<vmem>>, vector<1x1x8x64xf32>
    %46 = vector.shape_cast %45 : vector<1x1x8x64xf32> to vector<8x64xf32>
    %47 = tpu.concatenate %46, %46 in 1 : vector<8x64xf32>, vector<8x64xf32> -> vector<8x128xf32>
    %c0_39 = arith.constant 0 : index
    %c80 = arith.constant 80 : index
    %c0_40 = arith.constant 0 : index
    %48 = vector.load %arg3[%c0_39, %c80, %c0_40] : memref<2x128x128xf32, #tpu.memory_space<vmem>>, vector<1x8x128xf32>
    %49 = vector.shape_cast %48 : vector<1x8x128xf32> to vector<8x128xf32>
    %50 = vector.shape_cast %47 : vector<8x128xf32> to vector<1x8x128xf32>
    tpu.vector_store %arg3[%c0_39, %c80, %c0_40], %50 {strides = array<i32>} : memref<2x128x128xf32, #tpu.memory_space<vmem>>, vector<1x8x128xf32>,
    %c0_41 = arith.constant 0 : index
    %c88 = arith.constant 88 : index
    %c0_42 = arith.constant 0 : index
    %51 = vector.load %arg3[%c0_41, %c88, %c0_42] : memref<2x128x128xf32, #tpu.memory_space<vmem>>, vector<1x8x128xf32>
    %52 = vector.shape_cast %51 : vector<1x8x128xf32> to vector<8x128xf32>
    %53 = vector.shape_cast %47 : vector<8x128xf32> to vector<1x8x128xf32>
    tpu.vector_store %arg3[%c0_41, %c88, %c0_42], %53 {strides = array<i32>} : memref<2x128x128xf32, #tpu.memory_space<vmem>>, vector<1x8x128xf32>,
    %c0_43 = arith.constant 0 : index
    %c6 = arith.constant 6 : index
    %c0_44 = arith.constant 0 : index
    %c0_45 = arith.constant 0 : index
    %54 = vector.load %arg2[%c0_43, %c6, %c0_44, %c0_45] : memref<2x8x8x64xf32, #tpu.memory_space<vmem>>, vector<1x1x8x64xf32>
    %55 = vector.shape_cast %54 : vector<1x1x8x64xf32> to vector<8x64xf32>
    %56 = tpu.concatenate %55, %55 in 1 : vector<8x64xf32>, vector<8x64xf32> -> vector<8x128xf32>
    %c0_46 = arith.constant 0 : index
    %c96 = arith.constant 96 : index
    %c0_47 = arith.constant 0 : index
    %57 = vector.load %arg3[%c0_46, %c96, %c0_47] : memref<2x128x128xf32, #tpu.memory_space<vmem>>, vector<1x8x128xf32>
    %58 = vector.shape_cast %57 : vector<1x8x128xf32> to vector<8x128xf32>
    %59 = vector.shape_cast %56 : vector<8x128xf32> to vector<1x8x128xf32>
    tpu.vector_store %arg3[%c0_46, %c96, %c0_47], %59 {strides = array<i32>} : memref<2x128x128xf32, #tpu.memory_space<vmem>>, vector<1x8x128xf32>,
    %c0_48 = arith.constant 0 : index
    %c104 = arith.constant 104 : index
    %c0_49 = arith.constant 0 : index
    %60 = vector.load %arg3[%c0_48, %c104, %c0_49] : memref<2x128x128xf32, #tpu.memory_space<vmem>>, vector<1x8x128xf32>
    %61 = vector.shape_cast %60 : vector<1x8x128xf32> to vector<8x128xf32>
    %62 = vector.shape_cast %56 : vector<8x128xf32> to vector<1x8x128xf32>
    tpu.vector_store %arg3[%c0_48, %c104, %c0_49], %62 {strides = array<i32>} : memref<2x128x128xf32, #tpu.memory_space<vmem>>, vector<1x8x128xf32>,
    %c0_50 = arith.constant 0 : index
    %c7 = arith.constant 7 : index
    %c0_51 = arith.constant 0 : index
    %c0_52 = arith.constant 0 : index
    %63 = vector.load %arg2[%c0_50, %c7, %c0_51, %c0_52] : memref<2x8x8x64xf32, #tpu.memory_space<vmem>>, vector<1x1x8x64xf32>
    %64 = vector.shape_cast %63 : vector<1x1x8x64xf32> to vector<8x64xf32>
    %65 = tpu.concatenate %64, %64 in 1 : vector<8x64xf32>, vector<8x64xf32> -> vector<8x128xf32>
    %c0_53 = arith.constant 0 : index
    %c112 = arith.constant 112 : index
    %c0_54 = arith.constant 0 : index
    %66 = vector.load %arg3[%c0_53, %c112, %c0_54] : memref<2x128x128xf32, #tpu.memory_space<vmem>>, vector<1x8x128xf32>
    %67 = vector.shape_cast %66 : vector<1x8x128xf32> to vector<8x128xf32>
    %68 = vector.shape_cast %65 : vector<8x128xf32> to vector<1x8x128xf32>
    tpu.vector_store %arg3[%c0_53, %c112, %c0_54], %68 {strides = array<i32>} : memref<2x128x128xf32, #tpu.memory_space<vmem>>, vector<1x8x128xf32>,
    %c0_55 = arith.constant 0 : index
    %c120 = arith.constant 120 : index
    %c0_56 = arith.constant 0 : index
    %69 = vector.load %arg3[%c0_55, %c120, %c0_56] : memref<2x128x128xf32, #tpu.memory_space<vmem>>, vector<1x8x128xf32>
    %70 = vector.shape_cast %69 : vector<1x8x128xf32> to vector<8x128xf32>
    %71 = vector.shape_cast %65 : vector<8x128xf32> to vector<1x8x128xf32>
    tpu.vector_store %arg3[%c0_55, %c120, %c0_56], %71 {strides = array<i32>} : memref<2x128x128xf32, #tpu.memory_space<vmem>>, vector<1x8x128xf32>,
    %c1_57 = arith.constant 1 : index
    %c0_58 = arith.constant 0 : index
    %c0_59 = arith.constant 0 : index
    %c0_60 = arith.constant 0 : index
    %72 = vector.load %arg2[%c1_57, %c0_58, %c0_59, %c0_60] : memref<2x8x8x64xf32, #tpu.memory_space<vmem>>, vector<1x1x8x64xf32>
    %73 = vector.shape_cast %72 : vector<1x1x8x64xf32> to vector<8x64xf32>
    %74 = tpu.concatenate %73, %73 in 1 : vector<8x64xf32>, vector<8x64xf32> -> vector<8x128xf32>
    %c1_61 = arith.constant 1 : index
    %c0_62 = arith.constant 0 : index
    %c0_63 = arith.constant 0 : index
    %75 = vector.load %arg3[%c1_61, %c0_62, %c0_63] : memref<2x128x128xf32, #tpu.memory_space<vmem>>, vector<1x8x128xf32>
    %76 = vector.shape_cast %75 : vector<1x8x128xf32> to vector<8x128xf32>
    %77 = vector.shape_cast %74 : vector<8x128xf32> to vector<1x8x128xf32>
    tpu.vector_store %arg3[%c1_61, %c0_62, %c0_63], %77 {strides = array<i32>} : memref<2x128x128xf32, #tpu.memory_space<vmem>>, vector<1x8x128xf32>,
    %c1_64 = arith.constant 1 : index
    %c8_65 = arith.constant 8 : index
    %c0_66 = arith.constant 0 : index
    %78 = vector.load %arg3[%c1_64, %c8_65, %c0_66] : memref<2x128x128xf32, #tpu.memory_space<vmem>>, vector<1x8x128xf32>
    %79 = vector.shape_cast %78 : vector<1x8x128xf32> to vector<8x128xf32>
    %80 = vector.shape_cast %74 : vector<8x128xf32> to vector<1x8x128xf32>
    tpu.vector_store %arg3[%c1_64, %c8_65, %c0_66], %80 {strides = array<i32>} : memref<2x128x128xf32, #tpu.memory_space<vmem>>, vector<1x8x128xf32>,
    %c1_67 = arith.constant 1 : index
    %c1_68 = arith.constant 1 : index
    %c0_69 = arith.constant 0 : index
    %c0_70 = arith.constant 0 : index
    %81 = vector.load %arg2[%c1_67, %c1_68, %c0_69, %c0_70] : memref<2x8x8x64xf32, #tpu.memory_space<vmem>>, vector<1x1x8x64xf32>
    %82 = vector.shape_cast %81 : vector<1x1x8x64xf32> to vector<8x64xf32>
    %83 = tpu.concatenate %82, %82 in 1 : vector<8x64xf32>, vector<8x64xf32> -> vector<8x128xf32>
    %c1_71 = arith.constant 1 : index
    %c16_72 = arith.constant 16 : index
    %c0_73 = arith.constant 0 : index
    %84 = vector.load %arg3[%c1_71, %c16_72, %c0_73] : memref<2x128x128xf32, #tpu.memory_space<vmem>>, vector<1x8x128xf32>
    %85 = vector.shape_cast %84 : vector<1x8x128xf32> to vector<8x128xf32>
    %86 = vector.shape_cast %83 : vector<8x128xf32> to vector<1x8x128xf32>
    tpu.vector_store %arg3[%c1_71, %c16_72, %c0_73], %86 {strides = array<i32>} : memref<2x128x128xf32, #tpu.memory_space<vmem>>, vector<1x8x128xf32>,
    %c1_74 = arith.constant 1 : index
    %c24_75 = arith.constant 24 : index
    %c0_76 = arith.constant 0 : index
    %87 = vector.load %arg3[%c1_74, %c24_75, %c0_76] : memref<2x128x128xf32, #tpu.memory_space<vmem>>, vector<1x8x128xf32>
    %88 = vector.shape_cast %87 : vector<1x8x128xf32> to vector<8x128xf32>
    %89 = vector.shape_cast %83 : vector<8x128xf32> to vector<1x8x128xf32>
    tpu.vector_store %arg3[%c1_74, %c24_75, %c0_76], %89 {strides = array<i32>} : memref<2x128x128xf32, #tpu.memory_space<vmem>>, vector<1x8x128xf32>,
    %c1_77 = arith.constant 1 : index
    %c2_78 = arith.constant 2 : index
    %c0_79 = arith.constant 0 : index
    %c0_80 = arith.constant 0 : index
    %90 = vector.load %arg2[%c1_77, %c2_78, %c0_79, %c0_80] : memref<2x8x8x64xf32, #tpu.memory_space<vmem>>, vector<1x1x8x64xf32>
    %91 = vector.shape_cast %90 : vector<1x1x8x64xf32> to vector<8x64xf32>
    %92 = tpu.concatenate %91, %91 in 1 : vector<8x64xf32>, vector<8x64xf32> -> vector<8x128xf32>
    %c1_81 = arith.constant 1 : index
    %c32_82 = arith.constant 32 : index
    %c0_83 = arith.constant 0 : index
    %93 = vector.load %arg3[%c1_81, %c32_82, %c0_83] : memref<2x128x128xf32, #tpu.memory_space<vmem>>, vector<1x8x128xf32>
    %94 = vector.shape_cast %93 : vector<1x8x128xf32> to vector<8x128xf32>
    %95 = vector.shape_cast %92 : vector<8x128xf32> to vector<1x8x128xf32>
    tpu.vector_store %arg3[%c1_81, %c32_82, %c0_83], %95 {strides = array<i32>} : memref<2x128x128xf32, #tpu.memory_space<vmem>>, vector<1x8x128xf32>,
    %c1_84 = arith.constant 1 : index
    %c40_85 = arith.constant 40 : index
    %c0_86 = arith.constant 0 : index
    %96 = vector.load %arg3[%c1_84, %c40_85, %c0_86] : memref<2x128x128xf32, #tpu.memory_space<vmem>>, vector<1x8x128xf32>
    %97 = vector.shape_cast %96 : vector<1x8x128xf32> to vector<8x128xf32>
    %98 = vector.shape_cast %92 : vector<8x128xf32> to vector<1x8x128xf32>
    tpu.vector_store %arg3[%c1_84, %c40_85, %c0_86], %98 {strides = array<i32>} : memref<2x128x128xf32, #tpu.memory_space<vmem>>, vector<1x8x128xf32>,
    %c1_87 = arith.constant 1 : index
    %c3_88 = arith.constant 3 : index
    %c0_89 = arith.constant 0 : index
    %c0_90 = arith.constant 0 : index
    %99 = vector.load %arg2[%c1_87, %c3_88, %c0_89, %c0_90] : memref<2x8x8x64xf32, #tpu.memory_space<vmem>>, vector<1x1x8x64xf32>
    %100 = vector.shape_cast %99 : vector<1x1x8x64xf32> to vector<8x64xf32>
    %101 = tpu.concatenate %100, %100 in 1 : vector<8x64xf32>, vector<8x64xf32> -> vector<8x128xf32>
    %c1_91 = arith.constant 1 : index
    %c48_92 = arith.constant 48 : index
    %c0_93 = arith.constant 0 : index
    %102 = vector.load %arg3[%c1_91, %c48_92, %c0_93] : memref<2x128x128xf32, #tpu.memory_space<vmem>>, vector<1x8x128xf32>
    %103 = vector.shape_cast %102 : vector<1x8x128xf32> to vector<8x128xf32>
    %104 = vector.shape_cast %101 : vector<8x128xf32> to vector<1x8x128xf32>
    tpu.vector_store %arg3[%c1_91, %c48_92, %c0_93], %104 {strides = array<i32>} : memref<2x128x128xf32, #tpu.memory_space<vmem>>, vector<1x8x128xf32>,
    %c1_94 = arith.constant 1 : index
    %c56_95 = arith.constant 56 : index
    %c0_96 = arith.constant 0 : index
    %105 = vector.load %arg3[%c1_94, %c56_95, %c0_96] : memref<2x128x128xf32, #tpu.memory_space<vmem>>, vector<1x8x128xf32>
    %106 = vector.shape_cast %105 : vector<1x8x128xf32> to vector<8x128xf32>
    %107 = vector.shape_cast %101 : vector<8x128xf32> to vector<1x8x128xf32>
    tpu.vector_store %arg3[%c1_94, %c56_95, %c0_96], %107 {strides = array<i32>} : memref<2x128x128xf32, #tpu.memory_space<vmem>>, vector<1x8x128xf32>,
    %c1_97 = arith.constant 1 : index
    %c4_98 = arith.constant 4 : index
    %c0_99 = arith.constant 0 : index
    %c0_100 = arith.constant 0 : index
    %108 = vector.load %arg2[%c1_97, %c4_98, %c0_99, %c0_100] : memref<2x8x8x64xf32, #tpu.memory_space<vmem>>, vector<1x1x8x64xf32>
    %109 = vector.shape_cast %108 : vector<1x1x8x64xf32> to vector<8x64xf32>
    %110 = tpu.concatenate %109, %109 in 1 : vector<8x64xf32>, vector<8x64xf32> -> vector<8x128xf32>
    %c1_101 = arith.constant 1 : index
    %c64_102 = arith.constant 64 : index
    %c0_103 = arith.constant 0 : index
    %111 = vector.load %arg3[%c1_101, %c64_102, %c0_103] : memref<2x128x128xf32, #tpu.memory_space<vmem>>, vector<1x8x128xf32>
    %112 = vector.shape_cast %111 : vector<1x8x128xf32> to vector<8x128xf32>
    %113 = vector.shape_cast %110 : vector<8x128xf32> to vector<1x8x128xf32>
    tpu.vector_store %arg3[%c1_101, %c64_102, %c0_103], %113 {strides = array<i32>} : memref<2x128x128xf32, #tpu.memory_space<vmem>>, vector<1x8x128xf32>,
    %c1_104 = arith.constant 1 : index
    %c72_105 = arith.constant 72 : index
    %c0_106 = arith.constant 0 : index
    %114 = vector.load %arg3[%c1_104, %c72_105, %c0_106] : memref<2x128x128xf32, #tpu.memory_space<vmem>>, vector<1x8x128xf32>
    %115 = vector.shape_cast %114 : vector<1x8x128xf32> to vector<8x128xf32>
    %116 = vector.shape_cast %110 : vector<8x128xf32> to vector<1x8x128xf32>
    tpu.vector_store %arg3[%c1_104, %c72_105, %c0_106], %116 {strides = array<i32>} : memref<2x128x128xf32, #tpu.memory_space<vmem>>, vector<1x8x128xf32>,
    %c1_107 = arith.constant 1 : index
    %c5_108 = arith.constant 5 : index
    %c0_109 = arith.constant 0 : index
    %c0_110 = arith.constant 0 : index
    %117 = vector.load %arg2[%c1_107, %c5_108, %c0_109, %c0_110] : memref<2x8x8x64xf32, #tpu.memory_space<vmem>>, vector<1x1x8x64xf32>
    %118 = vector.shape_cast %117 : vector<1x1x8x64xf32> to vector<8x64xf32>
    %119 = tpu.concatenate %118, %118 in 1 : vector<8x64xf32>, vector<8x64xf32> -> vector<8x128xf32>
    %c1_111 = arith.constant 1 : index
    %c80_112 = arith.constant 80 : index
    %c0_113 = arith.constant 0 : index
    %120 = vector.load %arg3[%c1_111, %c80_112, %c0_113] : memref<2x128x128xf32, #tpu.memory_space<vmem>>, vector<1x8x128xf32>
    %121 = vector.shape_cast %120 : vector<1x8x128xf32> to vector<8x128xf32>
    %122 = vector.shape_cast %119 : vector<8x128xf32> to vector<1x8x128xf32>
    tpu.vector_store %arg3[%c1_111, %c80_112, %c0_113], %122 {strides = array<i32>} : memref<2x128x128xf32, #tpu.memory_space<vmem>>, vector<1x8x128xf32>,
    %c1_114 = arith.constant 1 : index
    %c88_115 = arith.constant 88 : index
    %c0_116 = arith.constant 0 : index
    %123 = vector.load %arg3[%c1_114, %c88_115, %c0_116] : memref<2x128x128xf32, #tpu.memory_space<vmem>>, vector<1x8x128xf32>
    %124 = vector.shape_cast %123 : vector<1x8x128xf32> to vector<8x128xf32>
    %125 = vector.shape_cast %119 : vector<8x128xf32> to vector<1x8x128xf32>
    tpu.vector_store %arg3[%c1_114, %c88_115, %c0_116], %125 {strides = array<i32>} : memref<2x128x128xf32, #tpu.memory_space<vmem>>, vector<1x8x128xf32>,
    %c1_117 = arith.constant 1 : index
    %c6_118 = arith.constant 6 : index
    %c0_119 = arith.constant 0 : index
    %c0_120 = arith.constant 0 : index
    %126 = vector.load %arg2[%c1_117, %c6_118, %c0_119, %c0_120] : memref<2x8x8x64xf32, #tpu.memory_space<vmem>>, vector<1x1x8x64xf32>
    %127 = vector.shape_cast %126 : vector<1x1x8x64xf32> to vector<8x64xf32>
    %128 = tpu.concatenate %127, %127 in 1 : vector<8x64xf32>, vector<8x64xf32> -> vector<8x128xf32>
    %c1_121 = arith.constant 1 : index
    %c96_122 = arith.constant 96 : index
    %c0_123 = arith.constant 0 : index
    %129 = vector.load %arg3[%c1_121, %c96_122, %c0_123] : memref<2x128x128xf32, #tpu.memory_space<vmem>>, vector<1x8x128xf32>
    %130 = vector.shape_cast %129 : vector<1x8x128xf32> to vector<8x128xf32>
    %131 = vector.shape_cast %128 : vector<8x128xf32> to vector<1x8x128xf32>
    tpu.vector_store %arg3[%c1_121, %c96_122, %c0_123], %131 {strides = array<i32>} : memref<2x128x128xf32, #tpu.memory_space<vmem>>, vector<1x8x128xf32>,
    %c1_124 = arith.constant 1 : index
    %c104_125 = arith.constant 104 : index
    %c0_126 = arith.constant 0 : index
    %132 = vector.load %arg3[%c1_124, %c104_125, %c0_126] : memref<2x128x128xf32, #tpu.memory_space<vmem>>, vector<1x8x128xf32>
    %133 = vector.shape_cast %132 : vector<1x8x128xf32> to vector<8x128xf32>
    %134 = vector.shape_cast %128 : vector<8x128xf32> to vector<1x8x128xf32>
    tpu.vector_store %arg3[%c1_124, %c104_125, %c0_126], %134 {strides = array<i32>} : memref<2x128x128xf32, #tpu.memory_space<vmem>>, vector<1x8x128xf32>,
    %c1_127 = arith.constant 1 : index
    %c7_128 = arith.constant 7 : index
    %c0_129 = arith.constant 0 : index
    %c0_130 = arith.constant 0 : index
    %135 = vector.load %arg2[%c1_127, %c7_128, %c0_129, %c0_130] : memref<2x8x8x64xf32, #tpu.memory_space<vmem>>, vector<1x1x8x64xf32>
    %136 = vector.shape_cast %135 : vector<1x1x8x64xf32> to vector<8x64xf32>
    %137 = tpu.concatenate %136, %136 in 1 : vector<8x64xf32>, vector<8x64xf32> -> vector<8x128xf32>
    %c1_131 = arith.constant 1 : index
    %c112_132 = arith.constant 112 : index
    %c0_133 = arith.constant 0 : index
    %138 = vector.load %arg3[%c1_131, %c112_132, %c0_133] : memref<2x128x128xf32, #tpu.memory_space<vmem>>, vector<1x8x128xf32>
    %139 = vector.shape_cast %138 : vector<1x8x128xf32> to vector<8x128xf32>
    %140 = vector.shape_cast %137 : vector<8x128xf32> to vector<1x8x128xf32>
    tpu.vector_store %arg3[%c1_131, %c112_132, %c0_133], %140 {strides = array<i32>} : memref<2x128x128xf32, #tpu.memory_space<vmem>>, vector<1x8x128xf32>,
    %c1_134 = arith.constant 1 : index
    %c120_135 = arith.constant 120 : index
    %c0_136 = arith.constant 0 : index
    %141 = vector.load %arg3[%c1_134, %c120_135, %c0_136] : memref<2x128x128xf32, #tpu.memory_space<vmem>>, vector<1x8x128xf32>
    %142 = vector.shape_cast %141 : vector<1x8x128xf32> to vector<8x128xf32>
    %143 = vector.shape_cast %137 : vector<8x128xf32> to vector<1x8x128xf32>
    tpu.vector_store %arg3[%c1_134, %c120_135, %c0_136], %143 {strides = array<i32>} : memref<2x128x128xf32, #tpu.memory_space<vmem>>, vector<1x8x128xf32>,
    return
  }
  func.func @transform_0(%arg0: i32, %arg1: i32) -> (i32, i32, i32, i32) {
    %c0_i32 = arith.constant 0 : i32
    %c0_i32_0 = arith.constant 0 : i32
    %c0_i32_1 = arith.constant 0 : i32
    return %arg0, %arg1, %c0_i32, %c0_i32_0 : i32, i32, i32, i32
  }
  func.func @transform_1(%arg0: i32, %arg1: i32) -> (i32, i32, i32) {
    %c0_i32 = arith.constant 0 : i32
    %c0_i32_0 = arith.constant 0 : i32
    return %arg0, %arg1, %c0_i32 : i32, i32, i32
  }
}

</mosaic_0001>

<bundles_post_ra>
// kernel: tpu_custom_call.1
= control target key start
LH: loop header
LB: loop body
LE: loop exit
PB: predicated region body
PF: predicated region fallthrough
CT: control target
= control target key end

     0   :  { %6 = vsyncpa [#allocation3], 0  ;;  %s885_s0 = inlined_call_operand.hbm [shape: f32[4,8,8,64], index: 0, kind: input, shape index: {}]   ;;  %s886_s1 = inlined_call_operand.hbm [shape: f32[4,128,128], index: 1, kind: output, shape index: {}]  }
   0x1   :  { %8 = vsyncpa [#allocation3 + $0x1], 0 }
   0x2   :  { %9 = vsyncpa [#allocation4], 0 }
   0x3   :  { %11 = vsyncpa [#allocation4 + $0x1], 0  ;;  %s653_s6 = smov 0   ;;  %s655_s7 = smov 0  }
   0x4   :  { %s657_s8 = smov 0   ;;  %s659_s9 = smov 0  }
   0x5   :  { %s661_s10 = smov 0   ;;  %s663_s11 = smov 0  }
   0x6 LB: > { %s407_s12 = sadd.s32 4294967295, %s634_s11   ;;  %s408_s13 = sadd.s32 4294967294, %s634_s11   ;;  %s634_s11 = sphi %s663_s11, %s17_s11   ;;  %s630_s10 = sphi %s661_s10, %s897_s10   ;;  %s626_s9 = sphi %s659_s9, %s896_s9   ;;  %s622_s8 = sphi %s657_s8, %s895_s8   ;;  %s618_s7 = sphi %s655_s7, %s894_s7   ;;  %s614_s6 = sphi %s653_s6, %s893_s6  }
   0x7   : > { %s29_s14 = sadd.s32 1, %s630_s10  ;;  %s38_s15 = sadd.s32 1, %s622_s8 }
   0x8   : > { %p31_p0 = scmp.ge.s32.totalorder %s29_s14, 2  ;;  %p45_p1 = scmp.ne.s32.totalorder %s622_s8, %s618_s7 }
   0x9   : > { %p46_p2 = scmp.eq.s32.totalorder %s634_s11, 0  ;;  %p51_p3 = scmp.ne.s32.totalorder %s618_s7, %s614_s6 }
   0xa   : > { %s899_s14 = smov (%p31_p0, %s29_s14), 0  ;;  %p52_p5 = scmp.eq.s32.totalorder %s407_s12, 0 }
   0xb   : > { %p694_p4 = por %p46_p2, %p45_p1  ;;  %s33_s17 = ssub.s32 %s630_s10, %s899_s14 }
   0xc   : > { %p77_p6 = scmp.eq.s32.totalorder %s407_s12, 1  ;;  %p36_p7 = scmp.eq.s32.totalorder %s33_s17, 0 }
   0xd   : > { %p700_p8 = por %p52_p5, %p51_p3  ;;  %p83_p10 = scmp.eq.s32.totalorder %s408_s13, 1 }
   0xe   : > { %p704_p9 = por %p77_p6, %p45_p1  ;;  %p471_p13 = scmp.lt.s32.totalorder %s634_s11, 2 }
   0xf   : > { %s709_s20 = scalar_select %p36_p7, %s622_s8, %s38_s15  }
  0x10   : > { %p711_p11 = por %p83_p10, %p51_p3  ;;  %s103_s22 = sand.u32 1, %s622_s8  }
  0x11   : > { %s411_s23 = sshll.u32 %s103_s22, 7  ;;  %s456_s24 = sshll.u32 %s630_s10, 11 }
  0x12   : > { %s116_s27 = scalar_lea.hbm %s885_s0, %s456_s24  ;;  %s107_s28 = scalar_lea.vmem [#allocation2], %s411_s23 }
  0x13   : > { %s117_s29 = sshll.u32 %s107_s28, 4  ;;  %p724_p0 = pnand %p471_p13, %p694_p4  ;;  %s118_s29 = int_to_ptr.vmem [resolvable:$true] %s117_s29 }
  0x14   : > { %p415_p1 = scmp.ge.s32.totalorder %s634_s11, 1  ;;  %s104_s2 = scalar_lea.sflag [#allocation3], %s103_s22 }
  0x15   : > { %p528_p2 = pneg %p724_p0  ;;  %s539_s3 = scalar_lea.vmem %s118_s29, 2048 }
  0x16   : > { %p540_p3 = scmp.ne.s32.totalorder %s118_s29, %s539_s3  ;;  %s636_s4 = smov [#allocation2]  }
  0x17   : > { %s544_s5 = sshll.u32 %s636_s4, 4  ;;  %s545_s5 = int_to_ptr.vmem [resolvable:$false] %s544_s5 }
  0x18   : > { %p542_p5 = pnand %p540_p3, %p528_p2  ;;  %s546_s12 = scalar_lea.vmem %s545_s5, 4096 }
  0x19   : > { %p547_p7 = scmp.lt.s32.totalorder %s118_s29, %s545_s5  ;;  %p548_p10 = scmp.lt.s32.totalorder %s546_s12, %s539_s3 }
  0x1a   : > { %p543_p6 = pneg %p542_p5 }
  0x1b   : > { %p549_p12 = por %p548_p10, %p547_p7 }
  0x1d   : > { %p550_p4 = pnand %p549_p12, %p543_p6 }
  0x1f   : > { %553 = shalt.err (!%p550_p4)
}
  0x20   : > { %s637_s13 = smov 128   ;;  %s638_s15 = smov 8  }
  0x21   : > { %466 = dma.hbm_to_vmem [thread:$0]  (!%p724_p0), %s116_s27, 2048, %s118_s29, %s104_s2, %s637_s13, %s637_s13, %s638_s15  }
  0x22   : > { %p125_p13 = scmp.lt.s32.totalorder %s634_s11, 3 }
  0x24   : > { %p126_p2 = pnand %p415_p1, %p125_p13 }
  0x25   : > { %s737_s16 = sand.u32 (!%p126_p2), 1, %s618_s7  }
  0x26   : > { %129 = sbr.rel (%p126_p2) target bundleno = 204 (0xcc), region = 24  ;;  %s416_s17 = sshll.u32 (!%p126_p2), %s737_s16, 7 }
  0x27   : > { %s132_s22 = scalar_lea.sflag (!%p126_p2), [#allocation3], %s737_s16  ;;  %s741_s23 = scalar_lea.vmem (!%p126_p2), [#allocation2], %s416_s17 }
  0x2b   : > { %605 = dma.done.wait (%p700_p8), %s132_s22, 2048  }
  0x2c   : > { %607 = vsyncadd (%p700_p8), %s132_s22, 4294965248  ;;  %v419_v0 = vld [vmem:[%s741_s23 + $0x10] sm:$0xff]  ;;  %v158_v1 = vld [vmem:[%s741_s23] sm:$0xff]  ;;  %s639_s24 = smov 64   ;;  %s417_s18 = sshll.u32 %s737_s16, 8  ;;  %vm163_vm0 = vcmask 523264  }
  0x2d   : > { %179 = vrot.lane.b32.xlu1 %v419_v0, %s639_s24  ;;  %160 = vrot.lane.b32.xlu0 %v158_v1, %s639_s24  ;;  %v420_v2 = vld [vmem:[%s741_s23 + $0x18] sm:$0xff]  ;;  %v418_v3 = vld [vmem:[%s741_s23 + $0x8] sm:$0xff]  ;;  %s778_s25 = scalar_lea.vmem [#allocation5], %s417_s18  ;;  %s458_s26 = sshll.u32 %s626_s9, 12 }
  0x2e   : > { %v422_v4 = vld [vmem:[%s741_s23 + $0x28] sm:$0xff]  ;;  %v421_v5 = vld [vmem:[%s741_s23 + $0x20] sm:$0xff]  ;;  %v424_v6 = vld [vmem:[%s741_s23 + $0x38] sm:$0xff]  ;;  %s320_s27 = sshll.u32 %s778_s25, 4  ;;  %s827_s30 = scalar_lea.hbm %s886_s1, %s458_s26  ;;  %s829_s27 = int_to_ptr.vmem [resolvable:$true] %s320_s27 }
  0x2f   : > { %v423_v7 = vld [vmem:[%s741_s23 + $0x30] sm:$0xff]  ;;  %v428_v8 = vld [vmem:[%s741_s23 + $0x48] sm:$0xff]  ;;  %v425_v9 = vld [vmem:[%s741_s23 + $0x40] sm:$0xff]  ;;  %s304_s9 = scalar_lea.sflag [#allocation4], %s737_s16  ;;  %s554_s2 = scalar_lea.vmem %s829_s27, 4096 }
  0x30   : > { %v434_v10 = vld [vmem:[%s741_s23 + $0x58] sm:$0xff]  ;;  %v431_v11 = vld [vmem:[%s741_s23 + $0x50] sm:$0xff]  ;;  %v760_v12 = vld [vmem:[%s741_s23 + $0x68] sm:$0xff]  ;;  %p555_p8 = scmp.ne.s32.totalorder %s829_s27, %s554_s2  ;;  %s640_s3 = smov [#allocation5]  }
  0x31   : > { %188 = vrot.lane.b32.xlu1 %v420_v2, %s639_s24  ;;  %170 = vrot.lane.b32.xlu0 %v418_v3, %s639_s24  ;;  %v763_v13 = vld [vmem:[%s741_s23 + $0x60] sm:$0xff]  ;;  %v768_v14 = vld [vmem:[%s741_s23 + $0x78] sm:$0xff]  ;;  %s558_s4 = sshll.u32 %s640_s3, 4  ;;  %s559_s4 = int_to_ptr.vmem [resolvable:$false] %s558_s4 }
  0x32   : > { %v771_v15 = vld [vmem:[%s741_s23 + $0x70] sm:$0xff]  ;;  %p556_p12 = pnand %p555_p8, %p704_p9  ;;  %s560_s5 = scalar_lea.vmem %s559_s4, 8192 }
  0x33   : > { %p561_p1 = scmp.lt.s32.totalorder %s829_s27, %s559_s4  ;;  %p562_p3 = scmp.lt.s32.totalorder %s560_s5, %s554_s2 }
  0x34   : > { %p557_p0 = pneg %p556_p12 }
  0x35   : > { %206 = vrot.lane.b32.xlu1 %v422_v4, %s639_s24  ;;  %197 = vrot.lane.b32.xlu0 %v421_v5, %s639_s24  ;;  %p563_p5 = por %p562_p3, %p561_p1 }
  0x37   : > { %p564_p6 = pnand %p563_p5, %p557_p0 }
  0x39   : > { %224 = vrot.lane.b32.xlu1 %v424_v6, %s639_s24  ;;  %215 = vrot.lane.b32.xlu0 %v423_v7, %s639_s24 }
  0x3d   : > { %243 = vrot.lane.b32.xlu1 %v428_v8, %s639_s24  ;;  %233 = vrot.lane.b32.xlu0 %v425_v9, %s639_s24 }
  0x41   : > { %261 = vrot.lane.b32.xlu1 %v434_v10, %s639_s24  ;;  %252 = vrot.lane.b32.xlu0 %v431_v11, %s639_s24 }
  0x45   : > { %279 = vrot.lane.b32.xlu1 %v760_v12, %s639_s24  ;;  %270 = vrot.lane.b32.xlu0 %v763_v13, %s639_s24 }
  0x49   : > { %297 = vrot.lane.b32.xlu1 %v768_v14, %s639_s24  ;;  %288 = vrot.lane.b32.xlu0 %v771_v15, %s639_s24 }
  0x9f   : > { %v180_v16 = vpop.permute.xlu1 %179  ;;  %v161_v17 = vpop.permute.xlu0 %160 }
  0xa0   : > { %v182_v18 = vsel %vm163_vm0, %v419_v0, %v180_v16  ;;  %v164_v19 = vsel %vm163_vm0, %v158_v1, %v161_v17 }
  0xa1   : > { %183 = vst [vmem:[%s778_s25 + $0x20] sm:$0xff] %v182_v18  ;;  %184 = vst [vmem:[%s778_s25 + $0x28] sm:$0xff] %v182_v18 }
  0xa2   : > { %165 = vst [vmem:[%s778_s25] sm:$0xff] %v164_v19  ;;  %166 = vst [vmem:[%s778_s25 + $0x8] sm:$0xff] %v164_v19 }
  0xa3   : > { %v189_v20 = vpop.permute.xlu1 %188  ;;  %v171_v21 = vpop.permute.xlu0 %170 }
  0xa4   : > { %v191_v22 = vsel %vm163_vm0, %v420_v2, %v189_v20  ;;  %v173_v23 = vsel %vm163_vm0, %v418_v3, %v171_v21 }
  0xa5   : > { %192 = vst [vmem:[%s778_s25 + $0x30] sm:$0xff] %v191_v22  ;;  %193 = vst [vmem:[%s778_s25 + $0x38] sm:$0xff] %v191_v22 }
  0xa6   : > { %174 = vst [vmem:[%s778_s25 + $0x10] sm:$0xff] %v173_v23  ;;  %175 = vst [vmem:[%s778_s25 + $0x18] sm:$0xff] %v173_v23 }
  0xa7   : > { %v207_v24 = vpop.permute.xlu1 %206  ;;  %v198_v25 = vpop.permute.xlu0 %197 }
  0xa8   : > { %v209_v26 = vsel %vm163_vm0, %v422_v4, %v207_v24  ;;  %v200_v27 = vsel %vm163_vm0, %v421_v5, %v198_v25 }
  0xa9   : > { %210 = vst [vmem:[%s778_s25 + $0x50] sm:$0xff] %v209_v26  ;;  %211 = vst [vmem:[%s778_s25 + $0x58] sm:$0xff] %v209_v26 }
  0xaa   : > { %201 = vst [vmem:[%s778_s25 + $0x40] sm:$0xff] %v200_v27  ;;  %202 = vst [vmem:[%s778_s25 + $0x48] sm:$0xff] %v200_v27 }
  0xab   : > { %v225_v28 = vpop.permute.xlu1 %224  ;;  %v216_v29 = vpop.permute.xlu0 %215 }
  0xac   : > { %v227_v30 = vsel %vm163_vm0, %v424_v6, %v225_v28  ;;  %v218_v31 = vsel %vm163_vm0, %v423_v7, %v216_v29 }
  0xad   : > { %228 = vst [vmem:[%s778_s25 + $0x70] sm:$0xff] %v227_v30  ;;  %229 = vst [vmem:[%s778_s25 + $0x78] sm:$0xff] %v227_v30 }
  0xae   : > { %219 = vst [vmem:[%s778_s25 + $0x60] sm:$0xff] %v218_v31  ;;  %220 = vst [vmem:[%s778_s25 + $0x68] sm:$0xff] %v218_v31 }
  0xaf   : > { %v244_v32 = vpop.permute.xlu1 %243  ;;  %v234_v33 = vpop.permute.xlu0 %233 }
  0xb0   : > { %v246_v34 = vsel %vm163_vm0, %v428_v8, %v244_v32  ;;  %v236_v35 = vsel %vm163_vm0, %v425_v9, %v234_v33 }
  0xb1   : > { %429 = vst [vmem:[%s778_s25 + $0x90] sm:$0xff] %v246_v34  ;;  %430 = vst [vmem:[%s778_s25 + $0x98] sm:$0xff] %v246_v34 }
  0xb2   : > { %426 = vst [vmem:[%s778_s25 + $0x80] sm:$0xff] %v236_v35  ;;  %427 = vst [vmem:[%s778_s25 + $0x88] sm:$0xff] %v236_v35 }
  0xb3   : > { %v262_v36 = vpop.permute.xlu1 %261  ;;  %v253_v37 = vpop.permute.xlu0 %252 }
  0xb4   : > { %v264_v38 = vsel %vm163_vm0, %v434_v10, %v262_v36  ;;  %v255_v39 = vsel %vm163_vm0, %v431_v11, %v253_v37 }
  0xb5   : > { %435 = vst [vmem:[%s778_s25 + $0xb0] sm:$0xff] %v264_v38  ;;  %436 = vst [vmem:[%s778_s25 + $0xb8] sm:$0xff] %v264_v38 }
  0xb6   : > { %432 = vst [vmem:[%s778_s25 + $0xa0] sm:$0xff] %v255_v39  ;;  %433 = vst [vmem:[%s778_s25 + $0xa8] sm:$0xff] %v255_v39 }
  0xb7   : > { %v280_v40 = vpop.permute.xlu1 %279  ;;  %v271_v41 = vpop.permute.xlu0 %270 }
  0xb8   : > { %v282_v42 = vsel %vm163_vm0, %v760_v12, %v280_v40  ;;  %v273_v43 = vsel %vm163_vm0, %v763_v13, %v271_v41 }
  0xb9   : > { %441 = vst [vmem:[%s778_s25 + $0xd0] sm:$0xff] %v282_v42  ;;  %442 = vst [vmem:[%s778_s25 + $0xd8] sm:$0xff] %v282_v42 }
  0xba   : > { %438 = vst [vmem:[%s778_s25 + $0xc0] sm:$0xff] %v273_v43  ;;  %439 = vst [vmem:[%s778_s25 + $0xc8] sm:$0xff] %v273_v43 }
  0xbb   : > { %v298_v44 = vpop.permute.xlu1 %297  ;;  %v289_v45 = vpop.permute.xlu0 %288 }
  0xbc   : > { %v300_v46 = vsel %vm163_vm0, %v768_v14, %v298_v44  ;;  %v291_v47 = vsel %vm163_vm0, %v771_v15, %v289_v45 }
  0xbd   : > { %447 = vst [vmem:[%s778_s25 + $0xf0] sm:$0xff] %v300_v46  ;;  %448 = vst [vmem:[%s778_s25 + $0xf8] sm:$0xff] %v300_v46 }
  0xbe   : > { %444 = vst [vmem:[%s778_s25 + $0xe0] sm:$0xff] %v291_v47  ;;  %445 = vst [vmem:[%s778_s25 + $0xe8] sm:$0xff] %v291_v47 }
  0xbf   : > { %567 = shalt.err (!%p564_p6)
}
  0xc0   : > { %s568_s12 = scalar_lea.hbm %s827_s30, 4096  ;;  %s572_s17 = scalar_lea.hbm %s886_s1, 8192 }
  0xc1   : > { %p569_p7 = scmp.ne.s32.totalorder %s827_s30, %s568_s12  ;;  %p573_p13 = scmp.lt.s32.totalorder %s827_s30, %s886_s1 }
  0xc2   : > { %p574_p2 = scmp.lt.s32.totalorder %s572_s17, %s568_s12 }
  0xc3   : > { %p570_p10 = pnand %p569_p7, %p704_p9 }
  0xc4   : > { %p575_p8 = por %p574_p2, %p573_p13 }
  0xc5   : > { %p571_p4 = pneg %p570_p10 }
  0xc7   : > { %p576_p12 = pnand %p575_p8, %p571_p4 }
  0xc9   : > { %579 = shalt.err (!%p576_p12)
}
  0xca   : > { %s641_s24 = smov 128   ;;  %s642_s18 = smov 8  }
  0xcb   : > { %461 = dma.vmem_to_hbm [thread:$0]  (%p704_p9), %s829_s27, 4096, %s827_s30, %s304_s9, %s641_s24, %s641_s24, %s642_s18  }
  0xcc PF: > { %s335_s25 = sand.u32 1, %s614_s6   ;;  %p892_p0 = scmp.ge.s32.totalorder %s634_s11, 2 }
  0xcd   : > { %s336_s26 = scalar_lea.sflag [#allocation4], %s335_s25 }
  0xce   : > { %p468_p1 = pnand %p892_p0, %p711_p11 }
  0xd0   : > { %p469_p3 = pneg %p468_p1 }
  0xd2   : > { %609 = dma.done.wait (%p469_p3), %s336_s26, 4096  }
  0xd3   : > { %611 = vsyncadd (%p469_p3), %s336_s26, 4294963200  ;;  %s17_s11 = sadd.s32 1, %s634_s11   ;;  %s893_s6 = smov %s618_s7 }
  0xd4   : > { %p14_p5 = scmp.ge.s32.totalorder %s17_s11, 4   ;;  %s894_s7 = smov %s622_s8 }
  0xd5   : > { %s895_s8 = smov %s709_s20  ;;  %s896_s9 = smov %s630_s10 }
  0xd6   : > { %s897_s10 = smov %s899_s14  ;;  %16 = sbr.rel (!%p14_p5) target bundleno = 6 (0x6), region = 85 }
  0xdb   :  { %341 = vsyncpa [#allocation3], 1 }
  0xdc   :  { %343 = vsyncpa [#allocation3 + $0x1], 1 }
  0xdd   :  { %344 = vsyncpa [#allocation4], 1 }
  0xde   :  { %346 = vsyncpa [#allocation4 + $0x1], 1 }

</bundles_post_ra>
